<compile_context>
chip_gen: v5e
topology: v5e:2x2
jax: 0.10.0
libtpu: 0.0.40
codegen_flags: <defaults>
</compile_context>

<pallas_src>
import jax
import jax.numpy as jnp
from jax.experimental import pallas as pl
from jax.experimental.pallas import tpu as pltpu


def _round_up(x, m):
    return ((x + m - 1) // m) * m


def _cdiv(a, b):
    return (a + b - 1) // b


def _make_icnn_kernel(*, n_z, in_dim, pad_w, out_dim, vpu_y, fused_y):
    """Fused ICNN forward kernel (static depth n_z, lane width pad_w)."""

    def kernel(z0_ref, wy_ref, *rest):
        wz_refs = rest[:n_z]
        out_ref = rest[n_z]

        if vpu_y:
            # Tiny contraction depth: y-projection as in_dim broadcast MACs on
            # the VPU (f32), leaving the MXU free for the z-chain.
            z0 = z0_ref[...]                                     # (TB, in_dim) f32

            def y_proj(layer):
                c0 = layer * pad_w
                acc = z0[:, 0:1] * wy_ref[0:1, c0:c0 + pad_w]
                for k in range(1, in_dim):
                    acc = acc + z0[:, k:k + 1] * wy_ref[k:k + 1, c0:c0 + pad_w]
                return acc                                       # (TB, pad_w) f32
        elif fused_y:
            # One wide MXU call covering every y-layer: z0 @ [Wy_0 | Wy_1 | ...].
            z0b = z0_ref[...].astype(jnp.bfloat16)
            zy_all = jnp.dot(z0b, wy_ref[...],
                             preferred_element_type=jnp.float32)  # (TB, n_y*P)

            def y_proj(layer):
                return zy_all[:, layer * pad_w:(layer + 1) * pad_w]
        else:
            # Wide hidden sizes: per-layer y dots inside the unrolled loop so
            # the largest temp is (TB, pad_w) and MXU/VPU work interleaves.
            z0b = z0_ref[...].astype(jnp.bfloat16)

            def y_proj(layer):
                c0 = layer * pad_w
                return jnp.dot(z0b, wy_ref[:, c0:c0 + pad_w],
                               preferred_element_type=jnp.float32)

        # z = relu(y_layers[0](z0))
        z = jnp.maximum(y_proj(0), 0.0)

        # z = relu(y_layers[i+1](z0) + z_layers[i](z)); z weights already
        # exp()'d, zero-padded and bf16-cast in the wrapper. Unrolled Python
        # loop (tiny static depth); slice+dot+add+relu kept fused (no extra
        # VMEM temps -- matters for v5e's single store slot).
        for i in range(n_z):
            zz = jnp.dot(z.astype(jnp.bfloat16), wz_refs[i][...],
                         preferred_element_type=jnp.float32)
            z = jnp.maximum(y_proj(i + 1) + zz, 0.0)

        out_ref[...] = z[:, 0:out_dim].astype(out_ref.dtype)

    return kernel


def icnn_forward(z0, y_weights, z_weights, *, max_tile_b=2048):
    """ICNN forward pass.

    z0:        (batch, input_dim) float32
    y_weights: list of (input_dim, size_k) float32  (already transposed)
    z_weights: list of (prev_size, size_k) float32  (already transposed, raw
               log-space params; exp() applied in the wrapper)
    """
    batch, in_dim = z0.shape
    n_y = len(y_weights)
    n_z = len(z_weights)
    sizes = [w.shape[1] for w in y_weights]
    out_dim = sizes[-1]
    pad_w = _round_up(max(sizes), 128)          # lane-aligned hidden width

    vpu_y = in_dim <= 8                         # tiny K: VPU MACs beat an MXU dot
    fused_y = (not vpu_y) and (n_y * pad_w <= 1024)  # fuse y-matmuls only if temp is cheap

    # --- loop-invariant weight prep (done once by XLA, outside the grid) ---
    # MXU operands in bf16; VPU y-path stays f32 (v5e has no bf16 VPU).
    y_dtype = jnp.float32 if vpu_y else jnp.bfloat16
    wy_cat = jnp.concatenate(
        [jnp.pad(w.astype(jnp.float32), ((0, 0), (0, pad_w - w.shape[1])))
         for w in y_weights], axis=1).astype(y_dtype)            # (D, n_y*P)
    # Hoist exp() off the log-space z weights; zero-pad to (P, P); bf16 for MXU.
    wz_pos = [jnp.pad(jnp.exp(w.astype(jnp.float32)),
                      ((0, pad_w - w.shape[0]), (0, pad_w - w.shape[1]))
                      ).astype(jnp.bfloat16)
              for w in z_weights]                                # (P, P) each

    # --- batch tiling sized for v7x's 64 MiB VMEM (OK on v5e/v6e too) ---
    in_lanes = _round_up(in_dim, 128)
    out_lanes = _round_up(out_dim, 128)
    zy_cols = n_y * pad_w if fused_y else pad_w
    # f32 activation bytes per batch row: double-buffered z0/out tiles (lane
    # padded), live z + one temp, plus the zy temp(s).
    row_bytes = 4 * (2 * in_lanes + 2 * out_lanes + 2 * pad_w + zy_cols)
    act_budget = 24 << 20                       # leaves room for weights + headroom
    tb_cap = min(max((act_budget // row_bytes) // 8 * 8, 8), max_tile_b)

    rows = _round_up(batch, 8)
    n_tiles = _cdiv(rows, tb_cap)
    # Megacore (v7x): aim for an even tile count >= 2 when there's enough work
    # (>=512 rows per tile keeps per-step overhead amortized).
    if rows >= 2 * 512:
        n_tiles = max(n_tiles, 2)
    if n_tiles > 1 and n_tiles % 2:
        n_tiles += 1
    tb = _round_up(_cdiv(rows, n_tiles), 8)
    pb = n_tiles * tb
    z0p = jnp.pad(z0, ((0, pb - batch), (0, 0))) if pb != batch else z0
    grid = (pb // tb,)

    weight_bytes = (wy_cat.size * wy_cat.dtype.itemsize
                    + sum(w.size * w.dtype.itemsize for w in wz_pos))
    vmem_limit = int(min(max(tb * row_bytes + weight_bytes + (4 << 20),
                             16 << 20),
                         60 << 20))

    cost = pl.CostEstimate(
        flops=int(2 * pb * (in_dim * n_y * pad_w + n_z * pad_w * pad_w)),
        transcendentals=0,
        bytes_accessed=int(pb * in_dim * 4 + pb * out_dim * 4 + weight_bytes))

    kernel = _make_icnn_kernel(n_z=n_z, in_dim=in_dim, pad_w=pad_w,
                               out_dim=out_dim, vpu_y=vpu_y, fused_y=fused_y)

    # Grid-invariant weights: single-buffered (nothing to prefetch).
    resident = dict(pipeline_mode=pl.Buffered(1))

    out = pl.pallas_call(
        kernel,
        out_shape=jax.ShapeDtypeStruct((pb, out_dim), z0.dtype),
        grid=grid,
        in_specs=[pl.BlockSpec((tb, in_dim), lambda b: (b, 0)),           # z0 tile
                  pl.BlockSpec((in_dim, n_y * pad_w), lambda b: (0, 0),   # Wy (resident)
                               **resident)]
                 + [pl.BlockSpec((pad_w, pad_w), lambda b: (0, 0),        # Wz (resident)
                                 **resident)
                    for _ in range(n_z)],
        out_specs=pl.BlockSpec((tb, out_dim), lambda b: (b, 0)),
        compiler_params=pltpu.CompilerParams(
            dimension_semantics=("parallel",),
            vmem_limit_bytes=vmem_limit),
        cost_estimate=cost,
    )(z0p, wy_cat, *wz_pos)

    return out[:batch]


def _xavier_uniform(key, shape, gain):
    # PyTorch weight shape is (out, in); fan_in = shape[1], fan_out = shape[0].
    fan_out, fan_in = shape
    bound = gain * (6.0 / (fan_in + fan_out)) ** 0.5
    return jax.random.uniform(key, shape, jnp.float32, -bound, bound)


def build_icnn_params(key, input_dim, hidden_sizes,
                      w_init_y_param=0.1, w_init_z_param=0.1):
    """Deterministic parameter init mirroring ICNN.__init__ shapes."""
    sizes = list(hidden_sizes) + [1]
    y_weights_torch = []  # (out, in) like PyTorch
    for s in sizes:
        key, sub = jax.random.split(key)
        y_weights_torch.append(_xavier_uniform(sub, (s, input_dim),
                                               gain=w_init_y_param))
    z_shapes = []
    prev = hidden_sizes[0]
    for s in list(hidden_sizes[1:]) + [1]:
        z_shapes.append((s, prev))   # (out, in)
        prev = s
    # w_init_z = constant_(0.1); 'log' type -> effective weight exp(0.1)
    z_weights_torch = [jnp.full(sh, w_init_z_param, jnp.float32)
                       for sh in z_shapes]
    # Pre-transpose (glue) so the kernel computes x @ W.
    y_weights = [w.T for w in y_weights_torch]
    z_weights = [w.T for w in z_weights_torch]
    return y_weights, z_weights


def icnn_reference(z0, y_weights, z_weights):
    """Pure-JAX f32 reference of the PyTorch forward (same transposed layout).

    Note: matches ICNN.forward exactly -- the nonlinearity IS applied to the
    final size-1 layer, and icnn_bias=False / PositiveLinear zero-bias means
    no bias terms anywhere.
    """
    z = jnp.maximum(z0 @ y_weights[0], 0.0)
    for i in range(len(z_weights)):
        z = jnp.maximum(z0 @ y_weights[i + 1] + z @ jnp.exp(z_weights[i]), 0.0)
    return z


if __name__ == "__main__":
    key = jax.random.PRNGKey(0)

    batch = 2
    input_dim = 4
    hidden_sizes = (32, 32)

    key, pkey, xkey = jax.random.split(key, 3)
    y_weights, z_weights = build_icnn_params(pkey, input_dim, hidden_sizes)
    z0 = jax.random.normal(xkey, (batch, input_dim), jnp.float32)

    out = icnn_forward(z0, y_weights, z_weights)
    out = jax.block_until_ready(out)

    ref = icnn_reference(z0, y_weights, z_weights)
    assert out.shape == (batch, 1), out.shape
    # bf16 MXU operands with f32 accumulation -> bf16-level tolerance.
    assert jnp.allclose(out, ref, rtol=3e-2, atol=3e-2), (out, ref)

    print("KERNEL_OK")
</pallas_src>

<mosaic_0001>
module attributes {stable_mosaic.version = 11 : i64} {
  func.func @kernel(%arg0: i32, %arg1: memref<8x4xf32, #tpu.memory_space<vmem>>, %arg2: memref<4x384xf32, #tpu.memory_space<vmem>>, %arg3: memref<128x128xbf16, #tpu.memory_space<vmem>>, %arg4: memref<128x128xbf16, #tpu.memory_space<vmem>>, %arg5: memref<8x1xf32, #tpu.memory_space<vmem>>) attributes {dimension_semantics = [#tpu.dimension_semantics<parallel>], iteration_bounds = array<i64: 1>, scalar_prefetch = 0 : i64, scratch_operands = 0 : i64, tpu.core_type = #tpu.core_type<tc>, window_params = [{transform_indices = @transform_0, window_bounds = array<i64: 8, 4>}, {pipeline_mode = #tpu.pipeline_mode<synchronous>, transform_indices = @transform_1, window_bounds = array<i64: 4, 384>}, {pipeline_mode = #tpu.pipeline_mode<synchronous>, transform_indices = @transform_2, window_bounds = array<i64: 128, 128>}, {pipeline_mode = #tpu.pipeline_mode<synchronous>, transform_indices = @transform_3, window_bounds = array<i64: 128, 128>}, {transform_indices = @transform_4, window_bounds = array<i64: 8, 1>}]} {
    %c0 = arith.constant 0 : index
    %c0_0 = arith.constant 0 : index
    %0 = vector.load %arg1[%c0, %c0_0] : memref<8x4xf32, #tpu.memory_space<vmem>>, vector<8x4xf32>
    %1 = vector.extract_strided_slice %0 {offsets = [0, 0], sizes = [8, 1], strides = [1, 1]} : vector<8x4xf32> to vector<8x1xf32>
    %c0_1 = arith.constant 0 : index
    %c0_2 = arith.constant 0 : index
    %2 = vector.load %arg2[%c0_1, %c0_2] : memref<4x384xf32, #tpu.memory_space<vmem>>, vector<1x128xf32>
    %3 = vector.broadcast %1 : vector<8x1xf32> to vector<8x128xf32>
    %4 = vector.broadcast %2 : vector<1x128xf32> to vector<8x128xf32>
    %5 = arith.mulf %3, %4 : vector<8x128xf32>
    %6 = vector.extract_strided_slice %0 {offsets = [0, 1], sizes = [8, 1], strides = [1, 1]} : vector<8x4xf32> to vector<8x1xf32>
    %c1 = arith.constant 1 : index
    %c0_3 = arith.constant 0 : index
    %7 = vector.load %arg2[%c1, %c0_3] : memref<4x384xf32, #tpu.memory_space<vmem>>, vector<1x128xf32>
    %8 = vector.broadcast %6 : vector<8x1xf32> to vector<8x128xf32>
    %9 = vector.broadcast %7 : vector<1x128xf32> to vector<8x128xf32>
    %10 = arith.mulf %8, %9 : vector<8x128xf32>
    %11 = arith.addf %5, %10 : vector<8x128xf32>
    %12 = vector.extract_strided_slice %0 {offsets = [0, 2], sizes = [8, 1], strides = [1, 1]} : vector<8x4xf32> to vector<8x1xf32>
    %c2 = arith.constant 2 : index
    %c0_4 = arith.constant 0 : index
    %13 = vector.load %arg2[%c2, %c0_4] : memref<4x384xf32, #tpu.memory_space<vmem>>, vector<1x128xf32>
    %14 = vector.broadcast %12 : vector<8x1xf32> to vector<8x128xf32>
    %15 = vector.broadcast %13 : vector<1x128xf32> to vector<8x128xf32>
    %16 = arith.mulf %14, %15 : vector<8x128xf32>
    %17 = arith.addf %11, %16 : vector<8x128xf32>
    %18 = vector.extract_strided_slice %0 {offsets = [0, 3], sizes = [8, 1], strides = [1, 1]} : vector<8x4xf32> to vector<8x1xf32>
    %c3 = arith.constant 3 : index
    %c0_5 = arith.constant 0 : index
    %19 = vector.load %arg2[%c3, %c0_5] : memref<4x384xf32, #tpu.memory_space<vmem>>, vector<1x128xf32>
    %20 = vector.broadcast %18 : vector<8x1xf32> to vector<8x128xf32>
    %21 = vector.broadcast %19 : vector<1x128xf32> to vector<8x128xf32>
    %22 = arith.mulf %20, %21 : vector<8x128xf32>
    %23 = arith.addf %17, %22 : vector<8x128xf32>
    %cst = arith.constant 0.000000e+00 : f32
    %24 = vector.broadcast %cst : f32 to vector<8x128xf32>
    %25 = arith.maximumf %23, %24 : vector<8x128xf32>
    %26 = arith.truncf %25 : vector<8x128xf32> to vector<8x128xbf16>
    %c0_6 = arith.constant 0 : index
    %c0_7 = arith.constant 0 : index
    %27 = vector.load %arg3[%c0_6, %c0_7] : memref<128x128xbf16, #tpu.memory_space<vmem>>, vector<128x128xbf16>
    %cst_8 = arith.constant dense<0.000000e+00> : vector<8x128xf32>
    %28 = tpu.matmul %26, %27, %cst_8 {dimension_numbers = #tpu.dot_dimension_numbers<[1], [0], [0], [1], [0, 0, 1, 1], [], []>} : vector<8x128xbf16>, vector<128x128xbf16>, vector<8x128xf32> -> vector<8x128xf32>
    %29 = vector.extract_strided_slice %0 {offsets = [0, 0], sizes = [8, 1], strides = [1, 1]} : vector<8x4xf32> to vector<8x1xf32>
    %c0_9 = arith.constant 0 : index
    %c128 = arith.constant 128 : index
    %30 = vector.load %arg2[%c0_9, %c128] : memref<4x384xf32, #tpu.memory_space<vmem>>, vector<1x128xf32>
    %31 = vector.broadcast %29 : vector<8x1xf32> to vector<8x128xf32>
    %32 = vector.broadcast %30 : vector<1x128xf32> to vector<8x128xf32>
    %33 = arith.mulf %31, %32 : vector<8x128xf32>
    %34 = vector.extract_strided_slice %0 {offsets = [0, 1], sizes = [8, 1], strides = [1, 1]} : vector<8x4xf32> to vector<8x1xf32>
    %c1_10 = arith.constant 1 : index
    %c128_11 = arith.constant 128 : index
    %35 = vector.load %arg2[%c1_10, %c128_11] : memref<4x384xf32, #tpu.memory_space<vmem>>, vector<1x128xf32>
    %36 = vector.broadcast %34 : vector<8x1xf32> to vector<8x128xf32>
    %37 = vector.broadcast %35 : vector<1x128xf32> to vector<8x128xf32>
    %38 = arith.mulf %36, %37 : vector<8x128xf32>
    %39 = arith.addf %33, %38 : vector<8x128xf32>
    %40 = vector.extract_strided_slice %0 {offsets = [0, 2], sizes = [8, 1], strides = [1, 1]} : vector<8x4xf32> to vector<8x1xf32>
    %c2_12 = arith.constant 2 : index
    %c128_13 = arith.constant 128 : index
    %41 = vector.load %arg2[%c2_12, %c128_13] : memref<4x384xf32, #tpu.memory_space<vmem>>, vector<1x128xf32>
    %42 = vector.broadcast %40 : vector<8x1xf32> to vector<8x128xf32>
    %43 = vector.broadcast %41 : vector<1x128xf32> to vector<8x128xf32>
    %44 = arith.mulf %42, %43 : vector<8x128xf32>
    %45 = arith.addf %39, %44 : vector<8x128xf32>
    %46 = vector.extract_strided_slice %0 {offsets = [0, 3], sizes = [8, 1], strides = [1, 1]} : vector<8x4xf32> to vector<8x1xf32>
    %c3_14 = arith.constant 3 : index
    %c128_15 = arith.constant 128 : index
    %47 = vector.load %arg2[%c3_14, %c128_15] : memref<4x384xf32, #tpu.memory_space<vmem>>, vector<1x128xf32>
    %48 = vector.broadcast %46 : vector<8x1xf32> to vector<8x128xf32>
    %49 = vector.broadcast %47 : vector<1x128xf32> to vector<8x128xf32>
    %50 = arith.mulf %48, %49 : vector<8x128xf32>
    %51 = arith.addf %45, %50 : vector<8x128xf32>
    %52 = arith.addf %51, %28 : vector<8x128xf32>
    %cst_16 = arith.constant 0.000000e+00 : f32
    %53 = vector.broadcast %cst_16 : f32 to vector<8x128xf32>
    %54 = arith.maximumf %52, %53 : vector<8x128xf32>
    %55 = arith.truncf %54 : vector<8x128xf32> to vector<8x128xbf16>
    %c0_17 = arith.constant 0 : index
    %c0_18 = arith.constant 0 : index
    %56 = vector.load %arg4[%c0_17, %c0_18] : memref<128x128xbf16, #tpu.memory_space<vmem>>, vector<128x128xbf16>
    %cst_19 = arith.constant dense<0.000000e+00> : vector<8x128xf32>
    %57 = tpu.matmul %55, %56, %cst_19 {dimension_numbers = #tpu.dot_dimension_numbers<[1], [0], [0], [1], [0, 0, 1, 1], [], []>} : vector<8x128xbf16>, vector<128x128xbf16>, vector<8x128xf32> -> vector<8x128xf32>
    %58 = vector.extract_strided_slice %0 {offsets = [0, 0], sizes = [8, 1], strides = [1, 1]} : vector<8x4xf32> to vector<8x1xf32>
    %c0_20 = arith.constant 0 : index
    %c256 = arith.constant 256 : index
    %59 = vector.load %arg2[%c0_20, %c256] : memref<4x384xf32, #tpu.memory_space<vmem>>, vector<1x128xf32>
    %60 = vector.broadcast %58 : vector<8x1xf32> to vector<8x128xf32>
    %61 = vector.broadcast %59 : vector<1x128xf32> to vector<8x128xf32>
    %62 = arith.mulf %60, %61 : vector<8x128xf32>
    %63 = vector.extract_strided_slice %0 {offsets = [0, 1], sizes = [8, 1], strides = [1, 1]} : vector<8x4xf32> to vector<8x1xf32>
    %c1_21 = arith.constant 1 : index
    %c256_22 = arith.constant 256 : index
    %64 = vector.load %arg2[%c1_21, %c256_22] : memref<4x384xf32, #tpu.memory_space<vmem>>, vector<1x128xf32>
    %65 = vector.broadcast %63 : vector<8x1xf32> to vector<8x128xf32>
    %66 = vector.broadcast %64 : vector<1x128xf32> to vector<8x128xf32>
    %67 = arith.mulf %65, %66 : vector<8x128xf32>
    %68 = arith.addf %62, %67 : vector<8x128xf32>
    %69 = vector.extract_strided_slice %0 {offsets = [0, 2], sizes = [8, 1], strides = [1, 1]} : vector<8x4xf32> to vector<8x1xf32>
    %c2_23 = arith.constant 2 : index
    %c256_24 = arith.constant 256 : index
    %70 = vector.load %arg2[%c2_23, %c256_24] : memref<4x384xf32, #tpu.memory_space<vmem>>, vector<1x128xf32>
    %71 = vector.broadcast %69 : vector<8x1xf32> to vector<8x128xf32>
    %72 = vector.broadcast %70 : vector<1x128xf32> to vector<8x128xf32>
    %73 = arith.mulf %71, %72 : vector<8x128xf32>
    %74 = arith.addf %68, %73 : vector<8x128xf32>
    %75 = vector.extract_strided_slice %0 {offsets = [0, 3], sizes = [8, 1], strides = [1, 1]} : vector<8x4xf32> to vector<8x1xf32>
    %c3_25 = arith.constant 3 : index
    %c256_26 = arith.constant 256 : index
    %76 = vector.load %arg2[%c3_25, %c256_26] : memref<4x384xf32, #tpu.memory_space<vmem>>, vector<1x128xf32>
    %77 = vector.broadcast %75 : vector<8x1xf32> to vector<8x128xf32>
    %78 = vector.broadcast %76 : vector<1x128xf32> to vector<8x128xf32>
    %79 = arith.mulf %77, %78 : vector<8x128xf32>
    %80 = arith.addf %74, %79 : vector<8x128xf32>
    %81 = arith.addf %80, %57 : vector<8x128xf32>
    %cst_27 = arith.constant 0.000000e+00 : f32
    %82 = vector.broadcast %cst_27 : f32 to vector<8x128xf32>
    %83 = arith.maximumf %81, %82 : vector<8x128xf32>
    %84 = vector.extract_strided_slice %83 {offsets = [0, 0], sizes = [8, 1], strides = [1, 1]} : vector<8x128xf32> to vector<8x1xf32>
    %c0_28 = arith.constant 0 : index
    %c0_29 = arith.constant 0 : index
    %85 = vector.load %arg5[%c0_28, %c0_29] : memref<8x1xf32, #tpu.memory_space<vmem>>, vector<8x1xf32>
    tpu.vector_store %arg5[%c0_28, %c0_29], %84 {strides = array<i32>} : memref<8x1xf32, #tpu.memory_space<vmem>>, vector<8x1xf32>,
    return
  }
  func.func @transform_0(%arg0: i32) -> (i32, i32) {
    %c0_i32 = arith.constant 0 : i32
    %c0_i32_0 = arith.constant 0 : i32
    return %arg0, %c0_i32 : i32, i32
  }
  func.func @transform_1(%arg0: i32) -> (i32, i32) {
    %c0_i32 = arith.constant 0 : i32
    %c0_i32_0 = arith.constant 0 : i32
    %c0_i32_1 = arith.constant 0 : i32
    return %c0_i32, %c0_i32_0 : i32, i32
  }
  func.func @transform_2(%arg0: i32) -> (i32, i32) {
    %c0_i32 = arith.constant 0 : i32
    %c0_i32_0 = arith.constant 0 : i32
    %c0_i32_1 = arith.constant 0 : i32
    return %c0_i32, %c0_i32_0 : i32, i32
  }
  func.func @transform_3(%arg0: i32) -> (i32, i32) {
    %c0_i32 = arith.constant 0 : i32
    %c0_i32_0 = arith.constant 0 : i32
    %c0_i32_1 = arith.constant 0 : i32
    return %c0_i32, %c0_i32_0 : i32, i32
  }
  func.func @transform_4(%arg0: i32) -> (i32, i32) {
    %c0_i32 = arith.constant 0 : i32
    %c0_i32_0 = arith.constant 0 : i32
    return %arg0, %c0_i32 : i32, i32
  }
}

</mosaic_0001>

<bundles_post_ra>
// kernel: tpu_custom_call.1
= control target key start
LH: loop header
LB: loop body
LE: loop exit
PB: predicated region body
PF: predicated region fallthrough
CT: control target
= control target key end

     0   :  { %9 = vsyncpa [#allocation3], 0  ;;  %s519_s0 = inlined_call_operand.vmem [shape: f32[8,4], index: 0, kind: input, shape index: {}]   ;;  %s520_s1 = inlined_call_operand.vmem [shape: f32[4,384], index: 1, kind: input, shape index: {}]   ;;  %s521_s2 = inlined_call_operand.hbm [shape: bf16[128,128], index: 2, kind: input, shape index: {}]   ;;  %s522_s3 = inlined_call_operand.hbm [shape: bf16[128,128], index: 3, kind: input, shape index: {}]   ;;  %s523_s4 = inlined_call_operand.vmem [shape: f32[8,1], index: 4, kind: output, shape index: {}]  }
   0x1   :  { %s19_s17 = sshll.u32 %s521_s2, 4  ;;  %s20_s17 = int_to_ptr.hbm [resolvable:$true] %s19_s17 }
   0x2   :  { %10 = vsyncpa [#allocation5], 0  ;;  %s438_s18 = smov [#allocation2]   ;;  %s32_s22 = sshll.u32 %s522_s3, 4  ;;  %s33_s22 = int_to_ptr.hbm [resolvable:$true] %s32_s22 }
   0x3   :  { %s21_s19 = sshll.u32 %s438_s18, 4  ;;  %s439_s23 = smov 64   ;;  %s22_s19 = int_to_ptr.vmem [resolvable:$true] %s21_s19 }
   0x4   :  { %s440_s24 = smov 4   ;;  %s441_s25 = smov [#allocation4]  }
   0x5   :  { %27 = dma.hbm_to_vmem [thread:$0]  %s20_s17, 1024, %s22_s19, [#allocation3], %s439_s23, %s439_s23, %s440_s24  }
   0x6   :  { %s34_s26 = sshll.u32 %s441_s25, 4  ;;  %s35_s26 = int_to_ptr.vmem [resolvable:$true] %s34_s26 }
   0x7   :  { %40 = dma.hbm_to_vmem [thread:$0]  %s33_s22, 1024, %s35_s26, [#allocation5], %s439_s23, %s439_s23, %s440_s24  }
   0x8   :  { %434 = dma.done.wait [#allocation3], 1024  }
   0x9   :  { %435 = vsyncadd [#allocation3], 4294966272 }
   0xa   :  { %436 = dma.done.wait [#allocation5], 1024  }
   0xb   :  { %437 = vsyncadd [#allocation5], 4294966272  ;;  %v442_v0 = vmov 0   ;;  %v443_v1 = vmov 2   ;;  %v49_v2 = vld [vmem:[%s519_s0] sm:$0xff]  ;;  %v352_v3 = vld [vmem:[#allocation2 + $0x38] sm:$0xff] }
   0xc   :  { %369 = vset.pattern.permute.xlu0 %v442_v0  ;;  %371 = vset.pattern.permute.xlu1 %v443_v1  ;;  %v351_v4 = vld [vmem:[#allocation2 + $0x30] sm:$0xff]  ;;  %v350_v5 = vld [vmem:[#allocation2 + $0x28] sm:$0xff]  ;;  %v444_v6 = vmov 1   ;;  %v445_v7 = vmov 3   ;;  %v349_v8 = vld [vmem:[#allocation2 + $0x20] sm:$0xff]  ;;  %vm273_vm0 = vcmask 7168  }
   0xd   :  { %53 = vperm.xlu0 %369, %v49_v2   ;;  %68 = vperm.xlu1 %371, %v49_v2   ;;  %v348_v9 = vld [vmem:[#allocation2 + $0x18] sm:$0xff]  ;;  %v347_v10 = vld [vmem:[#allocation2 + $0x10] sm:$0xff]  ;;  %v346_v11 = vld [vmem:[#allocation2 + $0x8] sm:$0xff] }
   0xe   :  { %148 = vmatpush.bf16.msra.mxu0 %v352_v3  ;;  %v345_v12 = vld [vmem:[#allocation2] sm:$0xff]  ;;  %v360_v13 = vld [vmem:[#allocation4 + $0x38] sm:$0xff]  ;;  %v359_v14 = vld [vmem:[#allocation4 + $0x30] sm:$0xff] }
   0xf   :  { %243 = vmatpush.bf16.msra.mxu1 %v360_v13  ;;  %v358_v15 = vld [vmem:[#allocation4 + $0x28] sm:$0xff]  ;;  %v357_v18 = vld [vmem:[#allocation4 + $0x20] sm:$0xff]  ;;  %v356_v21 = vld [vmem:[#allocation4 + $0x18] sm:$0xff] }
  0x10   :  { %v374_v19 = vld [vmem:[%s520_s1] ss:$0 sm:$0xff]  ;;  %v375_v20 = vld [vmem:[%s520_s1 + $0x4] ss:$0 sm:$0xff]  ;;  %v376_v22 = vld [vmem:[%s520_s1 + $0x8] ss:$0 sm:$0xff] }
  0x11   :  { %v377_v23 = vld [vmem:[%s520_s1 + $0x2] ss:$0 sm:$0xff]  ;;  %v378_v24 = vld [vmem:[%s520_s1 + $0x6] ss:$0 sm:$0xff]  ;;  %v380_v25 = vld [vmem:[%s520_s1 + $0x1] ss:$0 sm:$0xff] }
  0x12   :  { %149 = vmatpush.bf16.msra.mxu0 %v351_v4  ;;  %v381_v26 = vld [vmem:[%s520_s1 + $0x5] ss:$0 sm:$0xff]  ;;  %v382_v27 = vld [vmem:[%s520_s1 + $0x9] ss:$0 sm:$0xff]  ;;  %v379_v28 = vld [vmem:[%s520_s1 + $0xa] ss:$0 sm:$0xff] }
  0x13   :  { %244 = vmatpush.bf16.msra.mxu1 %v359_v14  ;;  %v383_v29 = vld [vmem:[%s520_s1 + $0x3] ss:$0 sm:$0xff]  ;;  %v384_v30 = vld [vmem:[%s520_s1 + $0x7] ss:$0 sm:$0xff]  ;;  %v385_v31 = vld [vmem:[%s520_s1 + $0xb] ss:$0 sm:$0xff] }
  0x14   :  { %v355_v32 = vld [vmem:[#allocation4 + $0x10] sm:$0xff]  ;;  %v354_v58 = vld [vmem:[#allocation4 + $0x8] sm:$0xff]  ;;  %v353_v59 = vld [vmem:[#allocation4] sm:$0xff] }
  0x15   :  { %370 = vset.pattern.permute.xlu0 %v444_v6  ;;  %372 = vset.pattern.permute.xlu1 %v445_v7 }
  0x16   :  { %60 = vperm.xlu0 %370, %v49_v2   ;;  %76 = vperm.xlu1 %372, %v49_v2  }
  0x17   :  { %150 = vmatpush.bf16.msra.mxu0 %v350_v5  ;;  %245 = vmatpush.bf16.msra.mxu1 %v358_v15 }
  0x1b   :  { %151 = vmatpush.bf16.msra.mxu0 %v349_v8  ;;  %246 = vmatpush.bf16.msra.mxu1 %v357_v18 }
  0x1e   :  { %373 = vset.pattern.permute.xlu0 %v445_v7 }
  0x1f   :  { %152 = vmatpush.bf16.msra.mxu0 %v348_v9  ;;  %247 = vmatpush.bf16.msra.mxu1 %v356_v21 }
  0x23   :  { %153 = vmatpush.bf16.msra.mxu0 %v347_v10  ;;  %248 = vmatpush.bf16.msra.mxu1 %v355_v32 }
  0x27   :  { %154 = vmatpush.bf16.msra.mxu0 %v346_v11  ;;  %249 = vmatpush.bf16.msra.mxu1 %v354_v58 }
  0x2b   :  { %155 = vmatpush.bf16.msra.mxu0 %v345_v12  ;;  %250 = vmatpush.bf16.msra.mxu1 %v353_v59 }
  0x7f   :  { %v54_v16 = vpop.permute.xlu0 %53  ;;  %v69_v17 = vpop.permute.xlu1 %68 }
  0x80   :  { %v57_v33 = vmul.f32 %v374_v19, %v54_v16  ;;  %v163_v34 = vmul.f32 %v375_v20, %v54_v16  ;;  %v258_v35 = vmul.f32 %v376_v22, %v54_v16  ;;  %v72_v38 = vmul.f32 %v377_v23, %v69_v17 }
  0x81   :  { %v170_v42 = vmul.f32 %v378_v24, %v69_v17  ;;  %v265_v43 = vmul.f32 %v379_v28, %v69_v17 }
  0x88   :  { %v61_v36 = vpop.permute.xlu0 %60  ;;  %v77_v37 = vpop.permute.xlu1 %76 }
  0x89   :  { %v64_v39 = vmul.f32 %v380_v25, %v61_v36  ;;  %v166_v40 = vmul.f32 %v381_v26, %v61_v36  ;;  %v261_v41 = vmul.f32 %v382_v27, %v61_v36  ;;  %v80_v44 = vmul.f32 %v383_v29, %v77_v37 }
  0x8a   :  { %v174_v45 = vmul.f32 %v384_v30, %v77_v37  ;;  %v269_v49 = vmul.f32 %v385_v31, %v77_v37 }
  0x8b   :  { %v65_v46 = vadd.f32 %v64_v39, %v57_v33  ;;  %v167_v47 = vadd.f32 %v166_v40, %v163_v34  ;;  %v262_v48 = vadd.f32 %v261_v41, %v258_v35 }
  0x8d   :  { %v73_v50 = vadd.f32 %v72_v38, %v65_v46  ;;  %v171_v51 = vadd.f32 %v170_v42, %v167_v47  ;;  %v266_v52 = vadd.f32 %v265_v43, %v262_v48 }
  0x8f   :  { %v81_v53 = vadd.f32 %v80_v44, %v73_v50  ;;  %v175_v54 = vadd.f32 %v174_v45, %v171_v51  ;;  %v270_v55 = vadd.f32 %v269_v49, %v266_v52 }
  0x91   :  { %v82_v56 = vmax.f32 %v81_v53, 0.0 }
  0x93   :  { %v83_v57 = vpack.c.bf16 %v82_v56, %v82_v56 }
  0x95   :  { %156 = vmatmul.bf16.vlgmr.msra.gmra.mxu0 %v83_v57 }
 0x112   :  { %v157_v60 = vpop.f32.mrf.mxu0 }
 0x113   :  { %v176_v61 = vadd.f32 %v175_v54, %v157_v60 }
 0x115   :  { %v177_v62 = vmax.f32 %v176_v61, 0.0 }
 0x117   :  { %v178_v63 = vpack.c.bf16 %v177_v62, %v177_v62 }
 0x119   :  { %251 = vmatmul.bf16.vlgmr.msra.gmra.mxu1 %v178_v63 }
 0x11a   :  { %v159_v0 = vpop.f32.mrf.mxu0 }
 0x196   :  { %v252_v1 = vpop.f32.mrf.mxu1 }
 0x197   :  { %v271_v2 = vadd.f32 %v270_v55, %v252_v1 }
 0x199   :  { %v272_v3 = vmax.f32 %v271_v2, 0.0 }
 0x19b   :  { %274 = vst.msk [vmem:[%s523_s4] sm:$0xff] %vm273_vm0, %v272_v3 }
 0x19e   :  { %v254_v4 = vpop.f32.mrf.mxu1 }
 0x19f   :  { %279 = vsyncpa [#allocation3], 1 }
 0x1a0   :  { %280 = vsyncpa [#allocation5], 1 }

</bundles_post_ra>
